<compile_context>
chip_gen: v7x
topology: tpu7x:2x2x1
jax: 0.10.0
libtpu: 0.0.40
codegen_flags: <defaults>
</compile_context>

<pallas_src>
import jax
import jax.numpy as jnp
import numpy as np
from jax import lax
from jax.experimental import pallas as pl
from jax.experimental.pallas import tpu as pltpu

_DEFAULT_TM = 512
_DEFAULT_TK = 2048


def _round_up(v, m):
    return ((v + m - 1) // m) * m


def _plan_tiles(n, tm, tk):
    """Pick 128-aligned tiles and independent row/col paddings for A (n x n)."""
    n128 = _round_up(n, 128)
    tm = max(128, min(tm, n128))
    tk = max(128, min(tk, n128))
    # Keep >= 2 row tiles whenever possible so the "parallel" row axis can feed
    # both v7x TensorCores (a single row tile idles one core: straight 2x loss).
    if n128 >= 2 * 128:
        tm = min(tm, max(128, (n128 // 2) // 128 * 128))
    rows_pad = _round_up(n, tm)
    cols_pad = _round_up(n, tk)
    return tm, tk, rows_pad, cols_pad


# --------------------------------------------------------------------------- #
# Stage 1: h = x @ W^T + b  (small, done once; padded rows forced to zero)
# --------------------------------------------------------------------------- #
def _make_linear_kernel(n_real, tr):
    def kernel(x_ref, wt_ref, b_ref, h_ref):
        h = jnp.dot(x_ref[...], wt_ref[...], preferred_element_type=jnp.float32)
        h = h + b_ref[...]
        row = pl.program_id(0) * tr + lax.broadcasted_iota(jnp.int32, h.shape, 0)
        h = jnp.where(row < n_real, h, 0.0)   # padded node rows stay exactly 0
        h_ref[...] = h.astype(h_ref.dtype)
    return kernel


# --------------------------------------------------------------------------- #
# Stage 2: out = A_hat @ h   (HBM-bound on the N^2 adjacency read)
# --------------------------------------------------------------------------- #
def gcn_spmm_kernel(a_ref, h_ref, o_ref, acc_ref):
    k = pl.program_id(1)

    @pl.when(k == 0)
    def _():
        acc_ref[...] = jnp.zeros_like(acc_ref)

    acc_ref[...] += jnp.dot(a_ref[...], h_ref[...],
                            preferred_element_type=jnp.float32)

    @pl.when(k == pl.num_programs(1) - 1)
    def _():
        o_ref[...] = acc_ref[...].astype(o_ref.dtype)


def gcn_conv(a_dense, x, w, b, *, tm=_DEFAULT_TM, tk=_DEFAULT_TK):
    """a_dense: normalized adjacency (ideally already padded bf16),
    x: (N, Fin), w: (Fout, Fin), b: (Fout,)."""
    n, fin = x.shape
    fout = w.shape[0]
    fout_pad = _round_up(fout, 128)                 # lane-dense output width
    tm, tk, rows_pad, cols_pad = _plan_tiles(n, tm, tk)

    # Adjacency: use as-is if already padded+cast (no extra HBM pass), else pad.
    if a_dense.shape == (rows_pad, cols_pad) and a_dense.dtype == jnp.bfloat16:
        a_p = a_dense
    else:
        a_p = jnp.zeros((rows_pad, cols_pad), jnp.bfloat16)
        a_p = a_p.at[:n, :n].set(a_dense[:n, :n].astype(jnp.bfloat16))

    # Small, O(N*Fin) pads for the Linear stage.
    x_p = jnp.zeros((cols_pad, fin), jnp.bfloat16).at[:n, :].set(
        x.astype(jnp.bfloat16))
    wt_p = jnp.zeros((fin, fout_pad), jnp.bfloat16).at[:, :fout].set(
        w.T.astype(jnp.bfloat16))
    b_p = jnp.zeros((1, fout_pad), jnp.float32).at[0, :fout].set(
        b.astype(jnp.float32))

    # ---- Stage 1: h once, bf16, shape (cols_pad, fout_pad) ----
    tr = 512
    while cols_pad % tr:
        tr //= 2                                     # >= 128 (cols_pad % 128 == 0)
    h_p = pl.pallas_call(
        _make_linear_kernel(n, tr),
        out_shape=jax.ShapeDtypeStruct((cols_pad, fout_pad), jnp.bfloat16),
        grid_spec=pltpu.PrefetchScalarGridSpec(
            num_scalar_prefetch=0,
            grid=(cols_pad // tr,),
            in_specs=[
                pl.BlockSpec((tr, fin), lambda i: (i, 0)),
                pl.BlockSpec((fin, fout_pad), lambda i: (0, 0)),
                pl.BlockSpec((1, fout_pad), lambda i: (0, 0)),
            ],
            out_specs=pl.BlockSpec((tr, fout_pad), lambda i: (i, 0)),
        ),
        compiler_params=pltpu.CompilerParams(dimension_semantics=("parallel",)),
    )(x_p, wt_p, b_p)

    # ---- Stage 2: out = A @ h ----
    grid = (rows_pad // tm, cols_pad // tk)
    cost = pl.CostEstimate(
        flops=2 * rows_pad * cols_pad * fout_pad,
        transcendentals=0,
        bytes_accessed=a_p.size * 2 + grid[0] * h_p.size * 2
        + rows_pad * fout_pad * 2,
    )
    out_p = pl.pallas_call(
        gcn_spmm_kernel,
        out_shape=jax.ShapeDtypeStruct((rows_pad, fout_pad), jnp.bfloat16),
        grid_spec=pltpu.PrefetchScalarGridSpec(
            num_scalar_prefetch=0,
            grid=grid,
            in_specs=[
                pl.BlockSpec((tm, tk), lambda i, k: (i, k)),        # A tile
                pl.BlockSpec((tk, fout_pad), lambda i, k: (k, 0)),  # h K-tile
            ],
            out_specs=pl.BlockSpec((tm, fout_pad), lambda i, k: (i, 0)),
            scratch_shapes=[pltpu.VMEM((tm, fout_pad), jnp.float32)],
        ),
        compiler_params=pltpu.CompilerParams(
            dimension_semantics=("parallel", "arbitrary")),
        cost_estimate=cost,
    )(a_p, h_p)

    return out_p[:n, :fout].astype(x.dtype)


def build_normalized_adjacency(edge_index, num_nodes, edge_weight=None,
                               pad_rows=None, pad_cols=None):
    """GCN-style A_hat = D^{-1/2} (A + I) D^{-1/2}, densified, built directly
    as the padded bf16 array the kernel wants (no extra device pad/cast pass).
    Accumulates duplicate / weighted edges (matches spmm semantics)."""
    rows = pad_rows if pad_rows is not None else num_nodes
    cols = pad_cols if pad_cols is not None else num_nodes
    src, dst = np.asarray(edge_index)
    if edge_weight is None:
        edge_weight = np.ones(src.shape[0], dtype=np.float32)
    loops = np.arange(num_nodes)
    src = np.concatenate([src, loops])
    dst = np.concatenate([dst, loops])
    vals = np.concatenate([np.asarray(edge_weight, dtype=np.float32),
                           np.ones(num_nodes, dtype=np.float32)])
    a = np.zeros((rows, cols), dtype=np.float32)
    np.add.at(a, (dst, src), vals)
    deg = a.sum(axis=1)[:num_nodes]
    d_inv_sqrt = np.where(deg > 0, 1.0 / np.sqrt(np.maximum(deg, 1e-12)), 0.0)
    a[:num_nodes, :num_nodes] *= d_inv_sqrt[:, None]
    a[:num_nodes, :num_nodes] *= d_inv_sqrt[None, :]
    return jnp.asarray(a, dtype=jnp.bfloat16)   # cast happens at host->device


if __name__ == "__main__":
    # Small deterministic problem: 64 nodes, in_feats=32, out_feats=16.
    num_nodes, in_feats, out_feats = 64, 32, 16

    key = jax.random.PRNGKey(0)
    k_x, k_w, k_b, k_e = jax.random.split(key, 4)

    # Node features.
    x = jax.random.normal(k_x, (num_nodes, in_feats), dtype=jnp.float32)

    # nn.Linear(in_feats, out_feats) params: W (out, in), b (out,).
    bound = 1.0 / np.sqrt(in_feats)
    w = jax.random.uniform(k_w, (out_feats, in_feats), minval=-bound,
                           maxval=bound, dtype=jnp.float32)
    b = jax.random.uniform(k_b, (out_feats,), minval=-bound, maxval=bound,
                           dtype=jnp.float32)

    # Deterministic random edge list (256 directed edges).
    num_edges = 256
    edges = jax.random.randint(k_e, (2, num_edges), minval=0, maxval=num_nodes)
    edge_index = np.asarray(edges)

    # Build the adjacency already padded + bf16 for the kernel.
    _, _, rows_pad, cols_pad = _plan_tiles(num_nodes, _DEFAULT_TM, _DEFAULT_TK)
    a_hat = build_normalized_adjacency(edge_index, num_nodes,
                                       pad_rows=rows_pad, pad_cols=cols_pad)

    out = gcn_conv(a_hat, x, w, b)
    jax.block_until_ready(out)

    # Reference in plain JAX f32 (same bf16-quantized adjacency; bf16 h/out in
    # the kernel -> relaxed tolerance).
    a_ref = jnp.asarray(a_hat[:num_nodes, :num_nodes], jnp.float32)
    ref = a_ref @ (x @ w.T + b)
    assert out.shape == (num_nodes, out_feats)
    np.testing.assert_allclose(np.asarray(out), np.asarray(ref),
                               rtol=2e-2, atol=2e-2)

    print("KERNEL_OK")
</pallas_src>

<mosaic_0001>
module attributes {stable_mosaic.version = 11 : i64} {
  func.func @kernel(%arg0: i32, %arg1: memref<128x32xbf16, #tpu.memory_space<vmem>>, %arg2: memref<32x128xbf16, #tpu.memory_space<vmem>>, %arg3: memref<1x128xf32, #tpu.memory_space<vmem>>, %arg4: memref<128x128xbf16, #tpu.memory_space<vmem>>) attributes {dimension_semantics = [#tpu.dimension_semantics<parallel>], iteration_bounds = array<i64: 1>, scalar_prefetch = 0 : i64, scratch_operands = 0 : i64, tpu.core_type = #tpu.core_type<tc>, window_params = [{transform_indices = @transform_0, window_bounds = array<i64: 128, 32>}, {pipeline_mode = #tpu.pipeline_mode<synchronous>, transform_indices = @transform_1, window_bounds = array<i64: 32, 128>}, {pipeline_mode = #tpu.pipeline_mode<synchronous>, transform_indices = @transform_2, window_bounds = array<i64: 1, 128>}, {transform_indices = @transform_3, window_bounds = array<i64: 128, 128>}]} {
    %c0 = arith.constant 0 : index
    %c0_0 = arith.constant 0 : index
    %0 = vector.load %arg1[%c0, %c0_0] : memref<128x32xbf16, #tpu.memory_space<vmem>>, vector<128x32xbf16>
    %c0_1 = arith.constant 0 : index
    %c0_2 = arith.constant 0 : index
    %1 = vector.load %arg2[%c0_1, %c0_2] : memref<32x128xbf16, #tpu.memory_space<vmem>>, vector<32x128xbf16>
    %cst = arith.constant dense<0.000000e+00> : vector<128x128xf32>
    %2 = tpu.matmul %0, %1, %cst {dimension_numbers = #tpu.dot_dimension_numbers<[1], [0], [0], [1], [0, 0, 1, 1], [], []>} : vector<128x32xbf16>, vector<32x128xbf16>, vector<128x128xf32> -> vector<128x128xf32>
    %c0_3 = arith.constant 0 : index
    %c0_4 = arith.constant 0 : index
    %3 = vector.load %arg3[%c0_3, %c0_4] : memref<1x128xf32, #tpu.memory_space<vmem>>, vector<1x128xf32>
    %4 = vector.broadcast %3 : vector<1x128xf32> to vector<128x128xf32>
    %5 = arith.addf %2, %4 : vector<128x128xf32>
    %c128_i32 = arith.constant 128 : i32
    %6 = arith.muli %arg0, %c128_i32 : i32
    %7 = tpu.iota {dimensions = array<i32: 0>} : vector<128x128xi32>
    %8 = vector.broadcast %6 : i32 to vector<128x128xi32>
    %9 = arith.addi %8, %7 : vector<128x128xi32>
    %c64_i32 = arith.constant 64 : i32
    %10 = vector.broadcast %c64_i32 : i32 to vector<128x128xi32>
    %11 = arith.cmpi slt, %9, %10 : vector<128x128xi32>
    %cst_5 = arith.constant 0.000000e+00 : f32
    %12 = vector.broadcast %cst_5 : f32 to vector<128x128xf32>
    %13 = arith.select %11, %5, %12 : vector<128x128xi1>, vector<128x128xf32>
    %14 = arith.truncf %13 : vector<128x128xf32> to vector<128x128xbf16>
    %c0_6 = arith.constant 0 : index
    %c0_7 = arith.constant 0 : index
    %15 = vector.load %arg4[%c0_6, %c0_7] : memref<128x128xbf16, #tpu.memory_space<vmem>>, vector<128x128xbf16>
    tpu.vector_store %arg4[%c0_6, %c0_7], %14 {strides = array<i32>} : memref<128x128xbf16, #tpu.memory_space<vmem>>, vector<128x128xbf16>,
    return
  }
  func.func @transform_0(%arg0: i32) -> (i32, i32) {
    %c0_i32 = arith.constant 0 : i32
    %c0_i32_0 = arith.constant 0 : i32
    return %arg0, %c0_i32 : i32, i32
  }
  func.func @transform_1(%arg0: i32) -> (i32, i32) {
    %c0_i32 = arith.constant 0 : i32
    %c0_i32_0 = arith.constant 0 : i32
    %c0_i32_1 = arith.constant 0 : i32
    return %c0_i32, %c0_i32_0 : i32, i32
  }
  func.func @transform_2(%arg0: i32) -> (i32, i32) {
    %c0_i32 = arith.constant 0 : i32
    %c0_i32_0 = arith.constant 0 : i32
    %c0_i32_1 = arith.constant 0 : i32
    return %c0_i32, %c0_i32_0 : i32, i32
  }
  func.func @transform_3(%arg0: i32) -> (i32, i32) {
    %c0_i32 = arith.constant 0 : i32
    %c0_i32_0 = arith.constant 0 : i32
    return %arg0, %c0_i32 : i32, i32
  }
}

</mosaic_0001>

<bundles_post_ra>
// kernel: tpu_custom_call.1
= control target key start
LH: loop header
LB: loop body
LE: loop exit
PB: predicated region body
PF: predicated region fallthrough
CT: control target
= control target key end

     0   :  { %vm95_vm0 = vcmask 261120   ;;  %s595_s0 = inlined_call_operand.vmem [shape: bf16[128,32], index: 0, kind: input, shape index: {}]   ;;  %s596_s1 = inlined_call_operand.vmem [shape: bf16[32,128], index: 1, kind: input, shape index: {}]   ;;  %s597_s2 = inlined_call_operand.vmem [shape: f32[1,128], index: 2, kind: input, shape index: {}]   ;;  %s598_s3 = inlined_call_operand.hbm [shape: bf16[128,128], index: 3, kind: output, shape index: {}]  }
   0x1   :  { %v484_v0 = vld [vmem:[%s596_s1] sm:$0xff]   ;;  %v485_v1 = vld [vmem:[%s596_s1 + $0x8] sm:$0xff]   ;;  %v490_v6 = vld [vmem:[%s595_s0 + $0x10] sm:$0xff]  }
   0x2   :  { %456 = vmatprep.subr.bf16.mxu0 %v484_v0  ;;  %476 = vmatprep.subr.bf16.mxu1 %v484_v0  ;;  %v486_v2 = vld [vmem:[%s595_s0] sm:$0xff]   ;;  %v487_v4 = vld [vmem:[%s595_s0 + $0x8] sm:$0xff]   ;;  %v492_v7 = vld [vmem:[%s595_s0 + $0x30] sm:$0xff]  }
   0x3   :  { %457 = vmatpush3.bf16.msra.mxu0 %v484_v0  ;;  %478 = vmatpush3.bf16.msra.mxu1 %v484_v0  ;;  %v488_v3 = vld [vmem:[%s595_s0 + $0x20] sm:$0xff]   ;;  %v489_v5 = vld [vmem:[%s595_s0 + $0x28] sm:$0xff]  }
   0x4   :  { %458 = vmatprep.subr.bf16.mxu0 %v485_v1  ;;  %477 = vmatprep.subr.bf16.mxu1 %v485_v1 }
   0x5   :  { %460 = vmatprep.mubr.msk.bf16.mxu0 %vm95_vm0, %v486_v2  ;;  %468 = vmatprep.mubr.msk.bf16.mxu1 %vm95_vm0, %v488_v3 }
   0x7   :  { %459 = vmatpush3.bf16.msra.mxu0 %v485_v1  ;;  %479 = vmatpush3.bf16.msra.mxu1 %v485_v1 }
   0xa   :  { %461 = vmatmul.mubr.msk.bf16.vlgmr.msra.gmra.mrb[0].mxu0 %vm95_vm0, %v487_v4  ;;  %469 = vmatmul.mubr.msk.bf16.vlgmr.msra.gmra.mrb[0].mxu1 %vm95_vm0, %v489_v5 }
   0xb   :  { %8 = vsyncpa [#allocation3], 0  ;;  %464 = vmatprep.mubr.msk.bf16.mxu0 %vm95_vm0, %v490_v6  ;;  %472 = vmatprep.mubr.msk.bf16.mxu1 %vm95_vm0, %v492_v7  ;;  %v491_v8 = vld [vmem:[%s595_s0 + $0x18] sm:$0xff]   ;;  %v518_v10 = vmov 0.0|0.0   ;;  %v380_v14 = vld [vmem:[%s597_s2] ss:$0 sm:$0xff] }
   0xc   :  { %v493_v9 = vld [vmem:[%s595_s0 + $0x38] sm:$0xff]   ;;  %v407_v11 = vcombine.low %v518_v10, %v518_v10  ;;  %v408_v12 = vcombine.high %v518_v10, %v518_v10  ;;  %s519_s0 = smov [#allocation2]  }
   0xd   :  { %s369_s2 = sshll.u32 %s519_s0, 4  ;;  %s370_s2 = int_to_ptr.vmem [resolvable:$true] %s369_s2 }
   0xe   :  { %356 = vst [vmem:[#allocation2 + $0x20] sm:$0xf] %v407_v11  ;;  %357 = vst [vmem:[#allocation2 + $0x24] sm:$0xf] %v408_v12  ;;  %s494_s6 = scalar_lea.vmem %s370_s2, 1024  ;;  %p499_p1 = scmp.lt.s32.totalorder %s370_s2, %s370_s2 }
   0xf   :  { %358 = vst [vmem:[#allocation2 + $0x28] sm:$0xf] %v407_v11  ;;  %359 = vst [vmem:[#allocation2 + $0x2c] sm:$0xf] %v408_v12  ;;  %p495_p0 = scmp.ne.s32.totalorder %s370_s2, %s494_s6  ;;  %p500_p2 = scmp.lt.s32.totalorder %s494_s6, %s494_s6 }
  0x10   :  { %360 = vst [vmem:[#allocation2 + $0x30] sm:$0xf] %v407_v11  ;;  %361 = vst [vmem:[#allocation2 + $0x34] sm:$0xf] %v408_v12 }
  0x11   :  { %362 = vst [vmem:[#allocation2 + $0x38] sm:$0xf] %v407_v11  ;;  %363 = vst [vmem:[#allocation2 + $0x3c] sm:$0xf] %v408_v12  ;;  %p501_p3 = por %p500_p2, %p499_p1 }
  0x12   :  { %465 = vmatmul.mubr.msk.bf16.gmra.mrb[4].mxu0 %vm95_vm0, %v491_v8  ;;  %473 = vmatmul.mubr.msk.bf16.gmra.mrb[4].mxu1 %vm95_vm0, %v493_v9 }
  0x13   :  { %p502_p4 = pnand %p501_p3, %p495_p0 }
  0xdd   :  { %v462_v13 = vpop.f32.mrb[0].mxu0  ;;  %v470_v15 = vpop.f32.mrb[0].mxu1 }
  0xde   :  { %v154_v16 = vpop.f32.mrb[1].mxu0  ;;  %v186_v17 = vpop.f32.mrb[1].mxu1  ;;  %v163_v20 = vadd.f32 %v462_v13, %v380_v14 }
  0xdf   :  { %v463_v18 = vpop.f32.mrb[2].mxu0  ;;  %v471_v19 = vpop.f32.mrb[2].mxu1  ;;  %v155_v24 = vadd.f32 %v380_v14, %v154_v16 }
  0xe0   :  { %v166_v21 = vadd.f32 %v463_v18, %v380_v14  ;;  %v157_v22 = vpop.f32.mrb[3].mxu0  ;;  %v189_v23 = vpop.f32.mrb[3].mxu1 }
  0xe1   :  { %v158_v25 = vadd.f32 %v380_v14, %v157_v22 }
  0xe2   :  { %v431_v26 = vpack.c.bf16 %v166_v21, %v163_v20 }
  0xe3   :  { %v426_v27 = vpack.c.bf16 %v158_v25, %v155_v24 }
  0xe4   :  { %443 = vst [vmem:[#allocation2 + $0x8] sm:$0xff] %v431_v26  }
  0xe5   :  { %427 = vst [vmem:[#allocation2] sm:$0xff] %v426_v27   ;;  %v466_v28 = vpop.f32.mrb[4].mxu0  ;;  %v474_v29 = vpop.f32.mrb[4].mxu1 }
  0xe6   :  { %v170_v30 = vpop.f32.mrb[5].mxu0  ;;  %v202_v31 = vpop.f32.mrb[5].mxu1  ;;  %v179_v34 = vadd.f32 %v466_v28, %v380_v14 }
  0xe7   :  { %v467_v32 = vpop.f32.mrb[6].mxu0  ;;  %v475_v33 = vpop.f32.mrb[6].mxu1  ;;  %v171_v38 = vadd.f32 %v380_v14, %v170_v30 }
  0xe8   :  { %v182_v35 = vadd.f32 %v467_v32, %v380_v14  ;;  %v173_v36 = vpop.f32.mrb[7].mxu0  ;;  %v205_v37 = vpop.f32.mrb[7].mxu1 }
  0xe9   :  { %v174_v39 = vadd.f32 %v380_v14, %v173_v36 }
  0xea   :  { %v441_v40 = vpack.c.bf16 %v182_v35, %v179_v34 }
  0xeb   :  { %v436_v41 = vpack.c.bf16 %v174_v39, %v171_v38 }
  0xec   :  { %445 = vst [vmem:[#allocation2 + $0x18] sm:$0xff] %v441_v40  }
  0xed   :  { %444 = vst [vmem:[#allocation2 + $0x10] sm:$0xff] %v436_v41  }
  0xee   :  { %505 = shalt.err (!%p502_p4)
}
  0xef   :  { %s506_s9 = scalar_lea.hbm %s598_s3, 1024 }
  0xf0   :  { %p507_p5 = scmp.ne.s32.totalorder %s598_s3, %s506_s9  ;;  %p510_p6 = scmp.lt.u32.totalorder %s506_s9, %s598_s3 }
  0xf2   :  { %p512_p7 = pnand %p510_p6, %p507_p5 }
  0xf4   :  { %515 = shalt.err (!%p512_p7)
}
  0xf5   :  { %s520_s14 = smov 64   ;;  %s521_s15 = smov 4  }
  0xf6   :  { %375 = dma.vmem_to_hbm [thread:$0]  %s370_s2, 1024, %s598_s3, [#allocation3], %s520_s14, %s520_s14, %s521_s15  }
  0xf7   :  { %516 = dma.done.wait [#allocation3], 1024  }
  0xf8   :  { %517 = vsyncadd [#allocation3], 4294966272 }
  0xf9   :  { %379 = vsyncpa [#allocation3], 1 }

</bundles_post_ra>
